<compile_context>
chip_gen: v7x
topology: tpu7x:2x2x1
jax: 0.10.0
libtpu: 0.0.40
codegen_flags: <defaults>
</compile_context>

<pallas_src>
import functools

import jax
import jax.numpy as jnp
from jax import lax
from jax.experimental import pallas as pl
from jax.experimental.pallas import tpu as pltpu


def _round_up(x, m):
    return (x + m - 1) // m * m


def _vmem_capacity_bytes():
    try:
        return int(pltpu.get_tpu_info().vmem_capacity_bytes)
    except Exception:
        return 128 * 1024 * 1024   # v5e/v6e default; v7x reports its own 64 MiB


# ----------------------------------------------------------------------------
# Fast path: VMEM-resident table + one-hot MXU matmul.
# ----------------------------------------------------------------------------
def _onehot_gather_kernel(ids_ref, table_ref, out_ref, *, vocab_size):
    """out[t, :] = table[ids[t], :] via one_hot(ids) @ table on the MXU.

    ids_ref   : (TB, 1) int32 VMEM block (already clamped to [0, V-1])
    table_ref : (V, D) VMEM block, resident across the whole grid
    out_ref   : (TB, D) lane-dense VMEM output block
    """
    ids = ids_ref[...]                                              # (TB, 1)
    tb = ids.shape[0]
    iota = lax.broadcasted_iota(jnp.int32, (tb, vocab_size), 1)     # (TB, V)
    one_hot = (iota == ids).astype(table_ref.dtype)                 # (TB, V)
    out_ref[...] = jnp.dot(
        one_hot, table_ref[...],
        preferred_element_type=jnp.float32,
        precision=jax.lax.Precision.HIGHEST,
    ).astype(out_ref.dtype)


# ----------------------------------------------------------------------------
# Streaming path: table stays in HBM, per-row async DMA gather.
# ----------------------------------------------------------------------------
def _streaming_gather_kernel(ids_ref, emb_hbm, out_ref, copy_sem, *,
                             token_block, ring):
    """Gather `token_block` embedding rows from HBM into the VMEM out block.

    ids_ref  : (Npad,) int32 in SMEM (scalar-prefetched, full array, clamped)
    emb_hbm  : (V, D) embedding table left in HBM (memory_space=pl.ANY)
    out_ref  : (TB, D) lane-dense output block in VMEM
    copy_sem : (R,) DMA semaphore ring
    """
    TB, R = token_block, ring
    base = pl.program_id(0) * TB

    def start_copy(t, row):
        pltpu.make_async_copy(emb_hbm.at[row], out_ref.at[t],
                              copy_sem.at[t % R]).start()

    def wait_copy(t):
        # Invariant: only the semaphore + dst shape matter for .wait();
        # emb_hbm.at[0] has the same (D,) shape as the original src row.
        pltpu.make_async_copy(emb_hbm.at[0], out_ref.at[t],
                              copy_sem.at[t % R]).wait()

    # Prime: put the first R row-DMAs in flight.
    def _prime(t, c):
        start_copy(t, ids_ref[base + t])
        return c
    lax.fori_loop(0, R, _prime, 0, unroll=True)

    # Steady state: read the id BEFORE the wait (DMA .wait() breaks SMEM
    # sst->sld forwarding, so the scalar load hides under the wait), then
    # reuse the semaphore slot for token t.  Partially unrolled for scalar ILP.
    def _steady(t, c):
        row = ids_ref[base + t]
        wait_copy(t - R)
        start_copy(t, row)
        return c
    lax.fori_loop(R, TB, _steady, 0, unroll=4)

    # Drain the last R in-flight copies before the block is written back.
    def _drain(t, c):
        wait_copy(t)
        return c
    lax.fori_loop(TB - R, TB, _drain, 0, unroll=True)


# ----------------------------------------------------------------------------
# Wrapper / dispatch.
# ----------------------------------------------------------------------------
def word2vec_embedding_forward(tag_ids, embedding_matrix, *,
                               token_block=None, max_inflight=16,
                               force_path=None):
    """Pallas equivalent of nn.Embedding.from_pretrained(emb)(tag_ids)."""
    B, S = tag_ids.shape
    V, D = embedding_matrix.shape
    N = B * S
    dtype = embedding_matrix.dtype
    itemsize = jnp.dtype(dtype).itemsize

    # nn.Embedding would raise on out-of-range ids; we clamp (JAX gather
    # semantics), hoisted out of the kernel so the hot loops stay scalar-lean.
    ids_flat = jnp.clip(tag_ids.reshape(N).astype(jnp.int32), 0, V - 1)

    vmem_cap = _vmem_capacity_bytes()
    table_budget = vmem_cap // 4          # 32 MiB on v5e/v6e, 16 MiB on v7x
    total_budget = vmem_cap // 2
    table_bytes = V * D * itemsize

    if force_path == "fast":
        use_fast = True
    elif force_path == "stream":
        use_fast = False
    else:
        use_fast = table_bytes <= table_budget

    def _fast_vmem(tb):
        return (table_bytes                  # resident table
                + tb * V * itemsize          # one-hot intermediate
                + 2 * tb * D * itemsize      # double-buffered output block
                + 2 * tb * 512)              # (TB, 1) int32 id blocks (tiled)

    # --- token block selection ---------------------------------------------
    if token_block is None:
        tb = 256 if use_fast else 1024       # big blocks amortize grid-step cost
        # Keep >= 2 grid steps when N allows so v7x's second TensorCore works.
        while tb > 8 and N <= tb:
            tb //= 2
    else:
        tb = max(8, _round_up(token_block, 8))

    if use_fast:
        while tb > 8 and _fast_vmem(tb) > total_budget:
            tb //= 2
        if _fast_vmem(tb) > total_budget and force_path != "fast":
            use_fast = False
            tb = 1024
            while tb > 8 and N <= tb:
                tb //= 2

    TB = max(8, _round_up(min(tb, _round_up(N, 8)), 8))
    Npad = _round_up(N, TB)
    grid = Npad // TB

    if Npad != N:
        ids_flat = jnp.pad(ids_flat, (0, Npad - N))   # pad with id 0 (valid)

    cost = pl.CostEstimate(
        flops=2 * Npad * V * D if use_fast else 0,
        transcendentals=0,
        bytes_accessed=Npad * D * itemsize * 2 + Npad * 4 + table_bytes)

    if use_fast:
        kernel = functools.partial(_onehot_gather_kernel, vocab_size=V)
        vmem_limit = min(vmem_cap * 3 // 4,
                         max(32 << 20, _fast_vmem(TB) + (8 << 20)))
        out_flat = pl.pallas_call(
            kernel,
            out_shape=jax.ShapeDtypeStruct((Npad, D), dtype),
            grid=(grid,),
            in_specs=[
                pl.BlockSpec((TB, 1), lambda i: (i, 0)),   # id column block
                pl.BlockSpec((V, D), lambda i: (0, 0)),    # resident table
            ],
            out_specs=pl.BlockSpec((TB, D), lambda i: (i, 0)),
            compiler_params=pltpu.CompilerParams(
                dimension_semantics=("parallel",),
                vmem_limit_bytes=int(vmem_limit)),
            cost_estimate=cost,
        )(ids_flat.reshape(Npad, 1), embedding_matrix)
    else:
        R = max(1, min(max_inflight, TB))
        kernel = functools.partial(_streaming_gather_kernel,
                                   token_block=TB, ring=R)
        out_flat = pl.pallas_call(
            kernel,
            out_shape=jax.ShapeDtypeStruct((Npad, D), dtype),
            grid_spec=pltpu.PrefetchScalarGridSpec(
                num_scalar_prefetch=1,                         # ids -> SMEM
                grid=(grid,),
                in_specs=[pl.BlockSpec(memory_space=pl.ANY)],  # table in HBM
                out_specs=pl.BlockSpec((TB, D), lambda i, ids: (i, 0)),
                scratch_shapes=[pltpu.SemaphoreType.DMA((R,))],
            ),
            compiler_params=pltpu.CompilerParams(
                dimension_semantics=("parallel",)),
            cost_estimate=cost,
        )(ids_flat, embedding_matrix)

    return out_flat[:N].reshape(B, S, D)


if __name__ == "__main__":
    key = jax.random.PRNGKey(0)
    k_emb, k_ids, k_emb2, k_ids2, k_ids3 = jax.random.split(key, 5)

    # Toy config consistent with the module (vocab=64, dim=128, batch=2, seq=8).
    V, D, B, S = 64, 128, 2, 8
    embedding_matrix = jax.random.normal(k_emb, (V, D), dtype=jnp.float32)
    tag_ids = jax.random.randint(k_ids, (B, S), 0, V, dtype=jnp.int32)

    out = jax.block_until_ready(
        word2vec_embedding_forward(tag_ids, embedding_matrix))
    ref = embedding_matrix[tag_ids]
    assert out.shape == (B, S, D)
    assert jnp.allclose(out, ref, atol=2e-2, rtol=0.0), \
        "fast-path mismatch vs reference gather (toy config)"

    # Non-multiple B*S exercises the padded/masked tail handling.
    ids_odd = jax.random.randint(k_ids3, (3, 7), 0, V, dtype=jnp.int32)
    out_odd = jax.block_until_ready(
        word2vec_embedding_forward(ids_odd, embedding_matrix))
    assert jnp.allclose(out_odd, embedding_matrix[ids_odd], atol=2e-2,
                        rtol=0.0), "fast-path mismatch (ragged tail)"

    # Larger config (fast path) + forced streaming path (large-vocab fallback).
    V2, D2, B2, S2 = 512, 128, 4, 128
    emb2 = jax.random.normal(k_emb2, (V2, D2), dtype=jnp.float32)
    ids2 = jax.random.randint(k_ids2, (B2, S2), 0, V2, dtype=jnp.int32)
    ref2 = emb2[ids2]

    out2 = jax.block_until_ready(word2vec_embedding_forward(ids2, emb2))
    assert jnp.allclose(out2, ref2, atol=2e-2, rtol=0.0), \
        "fast-path mismatch vs reference gather (large config)"

    out3 = jax.block_until_ready(
        word2vec_embedding_forward(ids2, emb2, force_path="stream"))
    assert jnp.array_equal(out3, ref2), \
        "streaming-path mismatch vs reference gather"

    print("KERNEL_OK")
</pallas_src>

<mosaic_0001>
module attributes {stable_mosaic.version = 11 : i64} {
  func.func @_onehot_gather_kernel(%arg0: i32, %arg1: memref<8x1xi32, #tpu.memory_space<vmem>>, %arg2: memref<64x128xf32, #tpu.memory_space<vmem>>, %arg3: memref<8x128xf32, #tpu.memory_space<vmem>>) attributes {dimension_semantics = [#tpu.dimension_semantics<parallel>], iteration_bounds = array<i64: 2>, scalar_prefetch = 0 : i64, scratch_operands = 0 : i64, tpu.core_type = #tpu.core_type<tc>, window_params = [{transform_indices = @transform_0, window_bounds = array<i64: 8, 1>}, {pipeline_mode = #tpu.pipeline_mode<synchronous>, transform_indices = @transform_1, window_bounds = array<i64: 64, 128>}, {transform_indices = @transform_2, window_bounds = array<i64: 8, 128>}]} {
    %c0 = arith.constant 0 : index
    %c0_0 = arith.constant 0 : index
    %0 = vector.load %arg1[%c0, %c0_0] : memref<8x1xi32, #tpu.memory_space<vmem>>, vector<8x1xi32>
    %1 = tpu.iota {dimensions = array<i32: 1>} : vector<8x64xi32>
    %2 = vector.broadcast %0 : vector<8x1xi32> to vector<8x64xi32>
    %3 = arith.cmpi eq, %1, %2 : vector<8x64xi32>
    %4 = arith.extui %3 : vector<8x64xi1> to vector<8x64xi32>
    %5 = arith.sitofp %4 : vector<8x64xi32> to vector<8x64xf32>
    %c0_1 = arith.constant 0 : index
    %c0_2 = arith.constant 0 : index
    %6 = vector.load %arg2[%c0_1, %c0_2] : memref<64x128xf32, #tpu.memory_space<vmem>>, vector<64x128xf32>
    %cst = arith.constant dense<0.000000e+00> : vector<8x128xf32>
    %7 = tpu.matmul %5, %6, %cst {dimension_numbers = #tpu.dot_dimension_numbers<[1], [0], [0], [1], [0, 0, 1, 1], [], []>, precision = #tpu.contract_precision<fp32>} : vector<8x64xf32>, vector<64x128xf32>, vector<8x128xf32> -> vector<8x128xf32>
    %c0_3 = arith.constant 0 : index
    %c0_4 = arith.constant 0 : index
    %8 = vector.load %arg3[%c0_3, %c0_4] : memref<8x128xf32, #tpu.memory_space<vmem>>, vector<8x128xf32>
    tpu.vector_store %arg3[%c0_3, %c0_4], %7 {strides = array<i32>} : memref<8x128xf32, #tpu.memory_space<vmem>>, vector<8x128xf32>,
    return
  }
  func.func @transform_0(%arg0: i32) -> (i32, i32) {
    %c0_i32 = arith.constant 0 : i32
    %c0_i32_0 = arith.constant 0 : i32
    return %arg0, %c0_i32 : i32, i32
  }
  func.func @transform_1(%arg0: i32) -> (i32, i32) {
    %c0_i32 = arith.constant 0 : i32
    %c0_i32_0 = arith.constant 0 : i32
    %c0_i32_1 = arith.constant 0 : i32
    return %c0_i32, %c0_i32_0 : i32, i32
  }
  func.func @transform_2(%arg0: i32) -> (i32, i32) {
    %c0_i32 = arith.constant 0 : i32
    %c0_i32_0 = arith.constant 0 : i32
    return %arg0, %c0_i32 : i32, i32
  }
}

</mosaic_0001>

<bundles_post_ra>
// kernel: tpu_custom_call.1
= control target key start
LH: loop header
LB: loop body
LE: loop exit
PB: predicated region body
PF: predicated region fallthrough
CT: control target
= control target key end

     0   :  { %7 = vsyncpa [#allocation3], 0  ;;  %s1475_s0 = inlined_call_operand.vmem [shape: s32[16,1], index: 0, kind: input, shape index: {}]   ;;  %s1476_s1 = inlined_call_operand.hbm [shape: f32[64,128], index: 1, kind: input, shape index: {}]   ;;  %s1477_s2 = inlined_call_operand.hbm [shape: f32[16,128], index: 2, kind: output, shape index: {}]  }
   0x1   :  { %8 = vsyncpa [#allocation4], 0 }
   0x2   :  { %10 = vsyncpa [#allocation4 + $0x1], 0  ;;  %s1239_s9 = smov 0   ;;  %s1241_s10 = smov 0  }
   0x3   :  { %s1243_s11 = smov 0   ;;  %s1245_s12 = smov 0  }
   0x4 LB: > { %s1260_s13 = sadd.s32 4294967295, %s1214_s12   ;;  %s798_s14 = sadd.s32 4294967294, %s1214_s12   ;;  %s1214_s12 = sphi %s1245_s12, %s1493_s12   ;;  %s1210_s11 = sphi %s1243_s11, %s1492_s11   ;;  %s1206_s10 = sphi %s1241_s10, %s1491_s10   ;;  %s1202_s9 = sphi %s1239_s9, %s1490_s9  }
   0x5   : > { %s1264_s15 = sadd.s32 1, %s1214_s12   ;;  %s70_s16 = sadd.s32 1, %s1210_s11 }
   0x6   : > { %s67_s17 = ssub.s32 %s1214_s12, %s1264_s15  ;;  %p80_p0 = scmp.ne.s32.totalorder %s1210_s11, %s1206_s10 }
   0x7   : > { %p68_p1 = scmp.eq.s32.totalorder %s67_s17, 0  ;;  %p81_p2 = scmp.eq.s32.totalorder %s1260_s13, 1 }
   0x8   : > { %p86_p3 = scmp.ne.s32.totalorder %s1206_s10, %s1202_s9  ;;  %p87_p4 = scmp.eq.s32.totalorder %s798_s14, 1 }
   0x9   : > { %s1275_s18 = scalar_select %p68_p1, %s1210_s11, %s70_s16  }
   0xa   : > { %p1277_p5 = por %p81_p2, %p80_p0  ;;  %p1281_p6 = por %p87_p4, %p86_p3 }
   0xb   : > { %p799_p7 = scmp.ge.s32.totalorder %s1214_s12, 1  ;;  %p94_p8 = scmp.lt.s32.totalorder %s1214_s12, 3 }
   0xc   : > { %s1481_s19 = scalar_select %p1277_p5, 1, 0 }
   0xd   : > { %s1482_s20 = scalar_select %p1281_p6, 1, 0 }
   0xe   : > { %p1478_p9 = scmp.eq.s32.totalorder %s1260_s13, 0  ;;  %p1288_p10 = pnand %p799_p7, %p94_p8 }
   0xf   : > { %s1216_s22 = smov [#allocation2]   ;;  %s1120_s27 = scalar_lea.hbm %s1476_s1, 1024 }
  0x10   : > { %s1483_s21 = scalar_select %p1288_p10, 1, 0 }
  0x11   : > { %s106_s23 = sshll.u32 %s1216_s22, 4  ;;  %p1069_p11 = pneg %p1288_p10  ;;  %s107_s23 = int_to_ptr.vmem [resolvable:$true] %s106_s23 }
  0x12   : > { %p1121_p13 = scmp.ne.s32.totalorder %s1476_s1, %s1120_s27  ;;  %p1127_p3 = scmp.lt.u32.totalorder %s1120_s27, %s1476_s1 }
  0x13   : > { %p1296_p12 = pnand %p1478_p9, %p1069_p11 }
  0x15   : > { %p1122_p0 = pneg %p1296_p12 }
  0x17   : > { %p1123_p1 = pnand %p1122_p0, %p1121_p13 }
  0x19   : > { %p1124_p2 = pneg %p1123_p1 }
  0x1b   : > { %p1129_p4 = pnand %p1127_p3, %p1124_p2 }
  0x1d   : > { %1132 = shalt.err (!%p1129_p4)
}
  0x1e   : > { %s1133_s4 = scalar_lea.vmem %s107_s23, 1024  ;;  %p1141_p9 = scmp.lt.s32.totalorder %s107_s23, %s107_s23 }
  0x1f   : > { %p1134_p7 = scmp.ne.s32.totalorder %s107_s23, %s1133_s4  ;;  %p1142_p6 = scmp.lt.s32.totalorder %s1133_s4, %s1133_s4 }
  0x21   : > { %p1136_p8 = pnand %p1134_p7, %p1122_p0  ;;  %p1143_p5 = por %p1142_p6, %p1141_p9 }
  0x23   : > { %p1137_p11 = pneg %p1136_p8 }
  0x25   : > { %p1144_p10 = pnand %p1143_p5, %p1137_p11 }
  0x27   : > { %1147 = shalt.err (!%p1144_p10)
}
  0x28   : > { %s1217_s5 = smov 128   ;;  %s1218_s6 = smov 8  }
  0x29   : > { %1072 = dma.hbm_to_vmem [thread:$0]  (!%p1296_p12), %s1476_s1, 1024, %s107_s23, [#allocation3], %s1217_s5, %s1217_s5, %s1218_s6  }
  0x2a   : > { %p1485_p13 = scmp.ne.s32.totalorder %s1483_s21, 0 }
  0x2b   : > { %p1486_p1 = scmp.eq.s32.totalorder (!%p1485_p13), %s1260_s13, 0 }
  0x2c   : > { %129 = sbr.rel (%p1485_p13) target bundleno = 458 (0x1ca), region = 28 }
  0x33   : > { %1193 = dma.done.wait (%p1486_p1), [#allocation3], 1024   ;;  %p1487_p0 = pmov %p1486_p1 }
  0x34   : > { %p150_p5 = scmp.lt.s32.totalorder %s1260_s13, 1  ;;  %v1219_v0 = vmov 0   ;;  %v1220_v1 = vmov 0.0|0.0   ;;  %v163_v3 = vld [vmem:[#allocation2] sm:$0xff]  ;;  %v164_v4 = vld [vmem:[#allocation2 + $0x8] sm:$0xff]  ;;  %v165_v7 = vld [vmem:[#allocation2 + $0x10] sm:$0xff] }
  0x35   : > { %1195 = vsyncadd (%p1487_p0), [#allocation3], 4294966272  ;;  %1119 = vset.pattern.permute.xlu0 %v1219_v0  ;;  %1018 = vmatprep.subr.bf16.mxu0 %v1220_v1  ;;  %v176_v5 = vand.u32 4294901760, %v163_v3  ;;  %v179_v6 = vand.u32 4294901760, %v164_v4  ;;  %v166_v8 = vld [vmem:[#allocation2 + $0x18] sm:$0xff]  ;;  %v167_v9 = vld [vmem:[#allocation2 + $0x20] sm:$0xff] }
  0x36   : > { %s151_s14 = scalar_select %p150_p5, %s1260_s13, 1  ;;  %982 = vmatprep.subr.bf16.mxu1 %v1220_v1  ;;  %v182_v10 = vand.u32 4294901760, %v165_v7  ;;  %v185_v11 = vand.u32 4294901760, %v166_v8  ;;  %v168_v12 = vld [vmem:[#allocation2 + $0x28] sm:$0xff]  ;;  %v188_v13 = vand.u32 4294901760, %v167_v9  ;;  %v169_v14 = vld [vmem:[#allocation2 + $0x30] sm:$0xff] }
  0x37   : > { %v170_v15 = vld [vmem:[#allocation2 + $0x38] sm:$0xff]  ;;  %v1329_v16 = vpack.c.bf16 %v179_v6, %v176_v5  ;;  %v1331_v17 = vsub.f32 %v163_v3, %v176_v5  ;;  %v1333_v18 = vsub.f32 %v164_v4, %v179_v6  ;;  %v191_v19 = vand.u32 4294901760, %v168_v12  ;;  %s147_s23 = sand.u32 1, %s1206_s10   ;;  %s811_s25 = sshll.u32 %s1260_s13, 7 }
  0x38   : > { %s805_s16 = sshll.u32 %s151_s14, 3  ;;  %v1335_v20 = vsub.f32 %v165_v7, %v182_v10  ;;  %v1337_v21 = vsub.f32 %v166_v8, %v185_v11  ;;  %v1339_v22 = vsub.f32 %v167_v9, %v188_v13  ;;  %v1343_v23 = vpack.c.bf16 %v185_v11, %v182_v10  ;;  %s804_s24 = sshll.u32 %s147_s23, 3 }
  0x39   : > { %s153_s22 = scalar_lea.vmem %s1475_s0, %s805_s16  ;;  %1020 = vmatpush3.bf16.msra.mxu0 %v1329_v16  ;;  %984 = vmatpush3.bf16.msra.mxu1 %v1329_v16  ;;  %v1345_v24 = vsub.f32 %v168_v12, %v191_v19  ;;  %v194_v25 = vand.u32 4294901760, %v169_v14  ;;  %v197_v26 = vand.u32 4294901760, %v170_v15  ;;  %v261_v27 = vand.u32 4294901760, %v1331_v17  ;;  %s149_s26 = scalar_lea.vmem [#allocation5], %s804_s24 }
  0x3a   : > { %v154_v2 = vld [vmem:[%s153_s22] sm:$0xff]  ;;  %1021 = vmatprep.subr.bf16.mxu0 %v1220_v1  ;;  %985 = vmatprep.subr.bf16.mxu1 %v1220_v1  ;;  %v268_v28 = vand.u32 4294901760, %v1333_v18  ;;  %vm1221_vm0 = vmmov 0   ;;  %v1222_v31 = vmov 0.0   ;;  %v1363_v35 = vpack.c.bf16 %v191_v19, %v188_v13  ;;  %s727_s27 = sshll.u32 %s149_s26, 4  ;;  %s1433_s30 = scalar_lea.hbm %s1477_s2, %s811_s25  ;;  %s1435_s27 = int_to_ptr.vmem [resolvable:$true] %s727_s27 }
  0x3b   : > { %158 = vperm.xlu0 %1119, %v154_v2   ;;  %v1351_v29 = vsub.f32 %v169_v14, %v194_v25  ;;  %v1353_v30 = vsub.f32 %v170_v15, %v197_v26  ;;  %941 = vmatprep.mubr.msk.f32.mxu0 %vm1221_vm0, %v1222_v31  ;;  %v262_v33 = vsub.f32 %v1331_v17, %v261_v27  ;;  %v275_v36 = vand.u32 4294901760, %v1335_v20  ;;  %s714_s3 = scalar_lea.sflag [#allocation4], %s147_s23  ;;  %s1148_s4 = scalar_lea.vmem %s1435_s27, 128 }
  0x3c   : > { %884 = vmatprep.mubr.msk.f32.mxu1 %vm1221_vm0, %v1222_v31  ;;  %v1031_v32 = vpack.c.bf16 %v268_v28, %v261_v27  ;;  %v269_v34 = vsub.f32 %v1333_v18, %v268_v28  ;;  %v282_v37 = vand.u32 4294901760, %v1337_v21  ;;  %v1371_v43 = vpack.c.bf16 %v197_v26, %v194_v25  ;;  %p1149_p6 = scmp.ne.s32.totalorder %s1435_s27, %s1148_s4  ;;  %p1488_p9 = scmp.ne.s32.totalorder %s1481_s19, 0 }
  0x3d   : > { %1023 = vmatpush3.bf16.msra.mxu0 %v1343_v23  ;;  %987 = vmatpush3.bf16.msra.mxu1 %v1343_v23  ;;  %v263_v38 = vand.u32 4294901760, %v262_v33  ;;  %v276_v41 = vsub.f32 %v1335_v20, %v275_v36  ;;  %v289_v47 = vand.u32 4294901760, %v1339_v22  ;;  %v296_v48 = vand.u32 4294901760, %v1345_v24  ;;  %s1223_s13 = smov [#allocation5]  }
  0x3e   : > { %1024 = vmatprep.subr.bf16.mxu0 %v1220_v1  ;;  %988 = vmatprep.subr.bf16.mxu1 %v1220_v1  ;;  %v270_v39 = vand.u32 4294901760, %v269_v34  ;;  %v1034_v40 = vpack.c.bf16 %v282_v37, %v275_v36  ;;  %v283_v42 = vsub.f32 %v1337_v21, %v282_v37  ;;  %v303_v55 = vand.u32 4294901760, %v1351_v29  ;;  %p1150_p10 = pnand %p1149_p6, %p1488_p9  ;;  %s1152_s5 = sshll.u32 %s1223_s13, 4  ;;  %s1153_s5 = int_to_ptr.vmem [resolvable:$false] %s1152_s5 }
  0x3f   : > { %v277_v45 = vand.u32 4294901760, %v276_v41  ;;  %v1037_v50 = vpack.c.bf16 %v296_v48, %v289_v47  ;;  %v290_v51 = vsub.f32 %v1339_v22, %v289_v47  ;;  %v297_v52 = vsub.f32 %v1345_v24, %v296_v48  ;;  %s1154_s6 = scalar_lea.vmem %s1153_s5, 256  ;;  %p1155_p2 = scmp.lt.s32.totalorder %s1435_s27, %s1153_s5 }
  0x40   : > { %v995_v44 = vpack.c.bf16 %v270_v39, %v263_v38  ;;  %v284_v46 = vand.u32 4294901760, %v283_v42  ;;  %v310_v56 = vand.u32 4294901760, %v1353_v30  ;;  %v304_v59 = vsub.f32 %v1351_v29, %v303_v55  ;;  %p1151_p12 = pneg %p1150_p10  ;;  %p1156_p3 = scmp.lt.s32.totalorder %s1154_s6, %s1148_s4 }
  0x41   : > { %1026 = vmatpush3.bf16.msra.mxu0 %v1363_v35  ;;  %990 = vmatpush3.bf16.msra.mxu1 %v1363_v35  ;;  %v291_v53 = vand.u32 4294901760, %v290_v51  ;;  %v298_v54 = vand.u32 4294901760, %v297_v52  ;;  %v1007_v0 = vpack.c.bf16 %v1333_v18, %v1331_v17  ;;  %v1010_v2 = vpack.c.bf16 %v1337_v21, %v1335_v20 }
  0x42   : > { %1027 = vmatprep.subr.bf16.mxu0 %v1220_v1  ;;  %991 = vmatprep.subr.bf16.mxu1 %v1220_v1  ;;  %v998_v49 = vpack.c.bf16 %v284_v46, %v277_v45  ;;  %v1040_v58 = vpack.c.bf16 %v310_v56, %v303_v55  ;;  %v311_v60 = vsub.f32 %v1353_v30, %v310_v56  ;;  %v305_v61 = vand.u32 4294901760, %v304_v59  ;;  %p1157_p4 = por %p1156_p3, %p1155_p2 }
  0x43   : > { %v1001_v57 = vpack.c.bf16 %v298_v54, %v291_v53  ;;  %v1013_v3 = vpack.c.bf16 %v1345_v24, %v1339_v22  ;;  %v1016_v4 = vpack.c.bf16 %v1353_v30, %v1351_v29  ;;  %v155_v5 = vlaneseq }
  0x44   : > { %v312_v62 = vand.u32 4294901760, %v311_v60  ;;  %vm171_vm1 = vcmask 523264   ;;  %p1158_p7 = pnand %p1157_p4, %p1151_p12 }
  0x45   : > { %1029 = vmatpush3.bf16.msra.mxu0 %v1371_v43  ;;  %993 = vmatpush3.bf16.msra.mxu1 %v1371_v43  ;;  %v156_v6 = vand.u32 127, %v155_v5 }
  0x46   : > { %1030 = vmatprep.subr.bf16.mxu0 %v1220_v1  ;;  %994 = vmatprep.subr.bf16.mxu1 %v1220_v1  ;;  %v1004_v63 = vpack.c.bf16 %v312_v62, %v305_v61 }
  0xba   : > { %v159_v7 = vpop.permute.xlu0 %158 }
  0xbb   : > { %vm160_vm2 = vcmp.eq.s32.totalorder %v156_v6, %v159_v7 }
  0xbc   : > { %v806_v8 = vsel %vm160_vm2, 1.0, %v1222_v31 }
  0xbd   : > { %v173_v9 = vsel %vm171_vm1, %v806_v8, 0 }
  0xbe   : > { %v249_v10 = vsub.f32 %v173_v9, %v173_v9 }
  0xc0   : > { %v250_v11 = vand.u32 4294901760, %v249_v10 }
  0xc2   : > { %942 = vmatmul.mubr.f32.vlgmr.msra.gmra.mrb[0].mxu0 %v250_v11  ;;  %v251_v12 = vsub.f32 %v249_v10, %v250_v11 }
  0xc3   : > { %1032 = vmatpush3.bf16.msra.mxu0 %v1031_v32  ;;  %960 = vmatprep.mubr.msk.f32.mxu0 %vm1221_vm0, %v1222_v31 }
  0xc4   : > { %1033 = vmatprep.subr.bf16.mxu0 %v1220_v1  ;;  %v252_v13 = vand.u32 4294901760, %v251_v12 }
  0xc6   : > { %885 = vmatmul.mubr.f32.vlgmr.msra.gmra.mrb[0].mxu1 %v252_v13 }
  0xc7   : > { %996 = vmatpush3.bf16.msra.mxu1 %v995_v44  ;;  %1035 = vmatpush3.bf16.msra.mxu0 %v1034_v40 }
  0xc8   : > { %997 = vmatprep.subr.bf16.mxu1 %v1220_v1  ;;  %1036 = vmatprep.subr.bf16.mxu0 %v1220_v1 }
  0xc9   : > { %903 = vmatprep.mubr.msk.f32.mxu1 %vm1221_vm0, %v1222_v31 }
  0xcb   : > { %999 = vmatpush3.bf16.msra.mxu1 %v998_v49  ;;  %1038 = vmatpush3.bf16.msra.mxu0 %v1037_v50 }
  0xcc   : > { %1000 = vmatprep.subr.bf16.mxu1 %v1220_v1  ;;  %1039 = vmatprep.subr.bf16.mxu0 %v1220_v1 }
  0xcf   : > { %1002 = vmatpush3.bf16.msra.mxu1 %v1001_v57  ;;  %1041 = vmatpush3.bf16.msra.mxu0 %v1040_v58 }
  0xd0   : > { %1003 = vmatprep.subr.bf16.mxu1 %v1220_v1  ;;  %1042 = vmatprep.subr.bf16.mxu0 %v1220_v1 }
  0xd2   : > { %961 = vmatmul.mubr.msk.f32.vlgmr.msra.gmra.mrb[0].mxu0 %vm171_vm1, %v806_v8 }
  0xd3   : > { %1005 = vmatpush3.bf16.msra.mxu1 %v1004_v63  ;;  %1044 = vmatpush3.bf16.msra.mxu0 %v1329_v16 }
  0xd4   : > { %1006 = vmatprep.subr.bf16.mxu1 %v1220_v1  ;;  %1045 = vmatprep.subr.bf16.mxu0 %v1220_v1 }
  0xd5   : > { %979 = vmatprep.mubr.msk.f32.mxu0 %vm1221_vm0, %v1222_v31 }
  0xd6   : > { %904 = vmatmul.mubr.msk.f32.vlgmr.msra.gmra.mrb[0].mxu1 %vm171_vm1, %v806_v8 }
  0xd7   : > { %1008 = vmatpush3.bf16.msra.mxu1 %v1007_v0  ;;  %1047 = vmatpush3.bf16.msra.mxu0 %v1343_v23 }
  0xd8   : > { %1009 = vmatprep.subr.bf16.mxu1 %v1220_v1  ;;  %1048 = vmatprep.subr.bf16.mxu0 %v1220_v1 }
  0xd9   : > { %922 = vmatprep.mubr.msk.f32.mxu1 %vm1221_vm0, %v1222_v31 }
  0xdb   : > { %1011 = vmatpush3.bf16.msra.mxu1 %v1010_v2  ;;  %1050 = vmatpush3.bf16.msra.mxu0 %v1363_v35 }
  0xdc   : > { %1012 = vmatprep.subr.bf16.mxu1 %v1220_v1  ;;  %1051 = vmatprep.subr.bf16.mxu0 %v1220_v1 }
  0xdf   : > { %1014 = vmatpush3.bf16.msra.mxu1 %v1013_v3  ;;  %1053 = vmatpush3.bf16.msra.mxu0 %v1371_v43 }
  0xe0   : > { %1015 = vmatprep.subr.bf16.mxu1 %v1220_v1 }
  0xe2   : > { %980 = vmatmul.mubr.msk.f32.vlgmr.msra.gmra.mrb[0].mxu0 %vm171_vm1, %v806_v8 }
  0xe3   : > { %1017 = vmatpush3.bf16.msra.mxu1 %v1016_v4 }
  0xe6   : > { %923 = vmatmul.mubr.f32.vlgmr.msra.gmra.mrb[0].mxu1 %v249_v10 }
 0x1b5   : > { %v708_v14 = vpop.f32.mrb[0].mxu0 }
 0x1b6   : > { %v981_v15 = vpop.f32.mrb[1].mxu0 }
 0x1b9   : > { %v453_v16 = vpop.f32.mrb[0].mxu1 }
 0x1ba   : > { %v1054_v17 = vadd.f32 %v708_v14, %v453_v16  ;;  %v924_v18 = vpop.f32.mrb[1].mxu1 }
 0x1bc   : > { %712 = vst [vmem:[%s149_s26] sm:$0xff] %v1054_v17 }
 0x1bd   : > { %1161 = shalt.err (!%p1158_p7)
}
 0x1be   : > { %s1162_s7 = scalar_lea.hbm %s1433_s30, 128  ;;  %s1166_s16 = scalar_lea.hbm %s1477_s2, 256 }
 0x1bf   : > { %p1163_p8 = scmp.ne.s32.totalorder %s1433_s30, %s1162_s7  ;;  %p1167_p1 = scmp.lt.u32.totalorder %s1433_s30, %s1477_s2 }
 0x1c0   : > { %p1168_p0 = scmp.lt.u32.totalorder %s1166_s16, %s1162_s7  ;;  %p1170_p6 = scmp.lt.u32.totalorder %s1162_s7, %s1433_s30 }
 0x1c1   : > { %p1164_p11 = pnand %p1163_p8, %p1488_p9 }
 0x1c2   : > { %p1169_p5 = por %p1168_p0, %p1167_p1 }
 0x1c3   : > { %p1165_p13 = pneg %p1164_p11 }
 0x1c4   : > { %p1171_p10 = por %p1170_p6, %p1169_p5 }
 0x1c6   : > { %p1172_p12 = pnand %p1171_p10, %p1165_p13 }
 0x1c8   : > { %1175 = shalt.err (!%p1172_p12)
}
 0x1c9   : > { %1067 = dma.vmem_to_hbm [thread:$0]  (%p1488_p9), %s1435_s27, 128, %s1433_s30, %s714_s3  }
 0x1ca PF: > { %p1079_p2 = scmp.ge.s32.totalorder %s1214_s12, 2  ;;  %s739_s22 = sand.u32 1, %s1202_s9  }
 0x1cb   : > { %p1489_p3 = scmp.ne.s32.totalorder %s1482_s20, 0  ;;  %s740_s23 = scalar_lea.sflag [#allocation4], %s739_s22 }
 0x1cd   : > { %p1074_p4 = pnand %p1079_p2, %p1489_p3 }
 0x1cf   : > { %1197 = dma.done.wait (!%p1074_p4), %s740_s23, 128  }
 0x1d0   : > { %1199 = vsyncadd (!%p1074_p4), %s740_s23, 4294967168  ;;  %p13_p7 = scmp.ge.s32.totalorder %s1264_s15, 4   ;;  %s1490_s9 = smov %s1206_s10 }
 0x1d1   : > { %s1491_s10 = smov %s1210_s11  ;;  %s1492_s11 = smov %s1275_s18 }
 0x1d2   : > { %s1493_s12 = smov %s1264_s15  ;;  %15 = sbr.rel (!%p13_p7) target bundleno = 4 (0x4), region = 68 }
 0x1d9   :  { %745 = vsyncpa [#allocation3], 1 }
 0x1da   :  { %747 = vsyncpa [#allocation3 + $0x1], 1 }
 0x1db   :  { %748 = vsyncpa [#allocation4], 1 }
 0x1dc   :  { %750 = vsyncpa [#allocation4 + $0x1], 1 }

</bundles_post_ra>
